<compile_context>
chip_gen: v6e
topology: v6e:2x2x1
jax: 0.10.0
libtpu: 0.0.40
codegen_flags: <defaults>
</compile_context>

<pallas_src>
from functools import reduce
from operator import mul

import jax
import jax.numpy as jnp
from jax.experimental import pallas as pl
from jax.experimental.pallas import tpu as pltpu


# Per-block VMEM budget (one block of traces-in + traces-out + spikes-int8).
# With double buffering this stays well under the default scoped-VMEM limit on
# every generation (v5e 16 MiB, v6e 32 MiB, v7x 32 MiB of 64 MiB physical), so
# no vmem_limit_bytes override is needed.
_BLOCK_BUDGET_BYTES = 4 << 20


def _choose_row_block(R: int, C: int) -> int:
    """Largest lane-friendly row block that fits the per-block VMEM budget."""
    bytes_per_row = C * (4 + 4 + 1)          # traces f32 in + f32 out + spikes i8
    if R * bytes_per_row <= _BLOCK_BUDGET_BYTES:
        return R                              # whole array in one block (grid of 1)
    max_rows = max(32, _BLOCK_BUDGET_BYTES // bytes_per_row)
    # Prefer multiples of 32 so the int8 spike block uses native (32,128) tiling.
    for step in (32, 8):
        best = 0
        d = step
        while d <= min(R, max_rows):
            if R % d == 0:
                best = d
            d += step
        if best:
            return best
    return R                                  # fallback: single full block


# ----------------------------------------------------------------------------
# Single-step kernel.
# ----------------------------------------------------------------------------
def _make_step_kernel(additive_spike_trace: bool):
    def kernel(decay_ref, scale_ref, traces_ref, spikes_ref, out_ref):
        decay = decay_ref[0]                              # SMEM scalar
        decayed = traces_ref[...] * decay                 # traces *= trace_decay
        spk = spikes_ref[...]                             # int8 0/1, cast in-kernel
        if additive_spike_trace:
            out_ref[...] = decayed + scale_ref[0] * spk.astype(jnp.float32)
        else:
            out_ref[...] = jnp.where(spk != 0, jnp.float32(1.0), decayed)
    return kernel


def trace_update(traces, spikes_bool, trace_decay, trace_scale,
                 additive_spike_trace):
    """One trace-update step on TPU (traces updated 'in place' via aliasing)."""
    R, C = traces.shape
    row_block = _choose_row_block(R, C)
    grid = (R // row_block,)

    decay_arr = jnp.asarray(trace_decay, jnp.float32).reshape(1)
    scale_arr = jnp.asarray(trace_scale, jnp.float32).reshape(1)
    spikes_i8 = spikes_bool.astype(jnp.int8)              # 1 B/elem HBM stream

    kernel = _make_step_kernel(additive_spike_trace)
    return pl.pallas_call(
        kernel,
        out_shape=jax.ShapeDtypeStruct((R, C), jnp.float32),
        grid=grid,
        in_specs=[
            pl.BlockSpec(memory_space=pltpu.SMEM),              # trace_decay
            pl.BlockSpec(memory_space=pltpu.SMEM),              # trace_scale
            pl.BlockSpec((row_block, C), lambda i: (i, 0)),     # traces (f32)
            pl.BlockSpec((row_block, C), lambda i: (i, 0)),     # spikes (int8)
        ],
        out_specs=pl.BlockSpec((row_block, C), lambda i: (i, 0)),
        input_output_aliases={2: 0},                            # in-place traces
        compiler_params=pltpu.CompilerParams(
            dimension_semantics=("parallel",)),
    )(decay_arr, scale_arr, traces, spikes_i8)


# ----------------------------------------------------------------------------
# Fused multi-step kernel: traces stay VMEM-resident across the time axis.
# ----------------------------------------------------------------------------
def _make_multistep_kernel(additive_spike_trace: bool):
    def kernel(decay_ref, scale_ref, traces_ref, spikes_ref, out_ref):
        t = pl.program_id(1)

        @pl.when(t == 0)
        def _():
            # Load the resident trace block once per row block.
            out_ref[...] = traces_ref[...]

        decay = decay_ref[0]
        decayed = out_ref[...] * decay
        spk = spikes_ref[0]                                # (row_block, C) int8
        if additive_spike_trace:
            out_ref[...] = decayed + scale_ref[0] * spk.astype(jnp.float32)
        else:
            out_ref[...] = jnp.where(spk != 0, jnp.float32(1.0), decayed)
    return kernel


def trace_update_steps(traces, spikes_T_bool, trace_decay, trace_scale,
                       additive_spike_trace):
    """Apply T trace-update steps in one launch; spikes_T_bool is [T, R, C]."""
    T, R, C = spikes_T_bool.shape
    assert traces.shape == (R, C)
    row_block = _choose_row_block(R, C)
    grid = (R // row_block, T)                             # time axis last

    decay_arr = jnp.asarray(trace_decay, jnp.float32).reshape(1)
    scale_arr = jnp.asarray(trace_scale, jnp.float32).reshape(1)
    spikes_i8 = spikes_T_bool.astype(jnp.int8)

    kernel = _make_multistep_kernel(additive_spike_trace)
    return pl.pallas_call(
        kernel,
        out_shape=jax.ShapeDtypeStruct((R, C), jnp.float32),
        grid=grid,
        in_specs=[
            pl.BlockSpec(memory_space=pltpu.SMEM),                   # trace_decay
            pl.BlockSpec(memory_space=pltpu.SMEM),                   # trace_scale
            pl.BlockSpec((row_block, C), lambda i, t: (i, 0)),       # traces (read once / row block)
            pl.BlockSpec((1, row_block, C), lambda i, t: (t, i, 0)), # spikes[t]
        ],
        # Same block index across t => output block VMEM-resident (accumulator).
        out_specs=pl.BlockSpec((row_block, C), lambda i, t: (i, 0)),
        input_output_aliases={2: 0},
        compiler_params=pltpu.CompilerParams(
            dimension_semantics=("parallel", "arbitrary")),
    )(decay_arr, scale_arr, traces, spikes_i8)


# ----------------------------------------------------------------------------
# Thin JAX-side re-implementation of the module's state handling (glue only).
# ----------------------------------------------------------------------------
class NeuralPopulation:
    def __init__(self, shape, spike_trace=True, additive_spike_trace=False,
                 tau_s=10.0, trace_scale=1.0, is_inhibitory=False,
                 learning=True):
        self.shape = tuple(shape)
        self.n = reduce(mul, self.shape)
        self.spike_trace = spike_trace
        self.additive_spike_trace = additive_spike_trace
        self.is_inhibitory = is_inhibitory
        self.learning = learning
        self.dt = None

        if self.spike_trace:
            self.traces = jnp.zeros(self.shape, jnp.float32)
            self.tau_s = jnp.asarray(tau_s, jnp.float32)
            if self.additive_spike_trace:
                self.trace_scale = jnp.asarray(trace_scale, jnp.float32)
            else:
                self.trace_scale = jnp.asarray(1.0, jnp.float32)
        self.s = jnp.zeros(self.shape, jnp.bool_)
        # matches `self.trace_decay = torch.ones(1)` in __init__
        self.trace_decay = jnp.ones((), jnp.float32)

    def compute_decay(self):
        # trace_decay = exp(-dt / tau_s)    (scalar setup -> plain JAX glue)
        if self.spike_trace:
            self.trace_decay = jnp.exp(-jnp.asarray(self.dt, jnp.float32)
                                       / self.tau_s)

    def forward(self, traces_input):
        # `traces_input` (pre-synaptic spike trace) is unused by the base class.
        if self.spike_trace:
            self.traces = trace_update(
                self.traces, self.s, self.trace_decay, self.trace_scale,
                self.additive_spike_trace)

    def forward_steps(self, spikes_T):
        # Fused T-step update (one launch; traces never round-trip HBM per step).
        if self.spike_trace:
            self.traces = trace_update_steps(
                self.traces, spikes_T, self.trace_decay, self.trace_scale,
                self.additive_spike_trace)

    def reset_state_variables(self):
        self.s = jnp.zeros(self.shape, jnp.bool_)
        if self.spike_trace:
            self.traces = jnp.zeros(self.shape, jnp.float32)

    # TODO(synk): compute_potential / compute_spike / refractory_and_reset are
    # abstract no-ops in the base class; nothing to lower to Pallas.


# ----------------------------------------------------------------------------
# Pure-JAX reference for verification.
# ----------------------------------------------------------------------------
def ref_step(traces, s_bool, decay, scale, additive):
    traces = traces * decay
    if additive:
        return traces + scale * s_bool.astype(jnp.float32)
    return jnp.where(s_bool, jnp.float32(1.0), traces)


if __name__ == "__main__":
    key = jax.random.PRNGKey(0)
    pop_shape = (32, 128)   # small lane-friendly population topology

    # ------- default config: additive_spike_trace=False ---------------------
    pop = NeuralPopulation(pop_shape, spike_trace=True,
                           additive_spike_trace=False, tau_s=10.0)
    pop.reset_state_variables()
    pop.dt = 1.0
    pop.compute_decay()

    k1, k2, k3, k4 = jax.random.split(key, 4)
    pop.traces = jax.random.uniform(k1, pop_shape, jnp.float32)
    pop.s = jax.random.bernoulli(k2, 0.2, pop_shape)

    expected = ref_step(pop.traces, pop.s, pop.trace_decay,
                        pop.trace_scale, False)
    pop.forward(jnp.zeros(pop_shape, jnp.float32))
    out1 = jax.block_until_ready(pop.traces)
    assert jnp.allclose(out1, expected, rtol=1e-6, atol=1e-6)

    # ------- additive config: additive_spike_trace=True ---------------------
    pop2 = NeuralPopulation(pop_shape, spike_trace=True,
                            additive_spike_trace=True, tau_s=15.0,
                            trace_scale=0.5)
    pop2.reset_state_variables()
    pop2.dt = 0.5
    pop2.compute_decay()
    pop2.traces = jax.random.uniform(k3, pop_shape, jnp.float32)
    pop2.s = jax.random.bernoulli(k2, 0.3, pop_shape)

    expected2 = ref_step(pop2.traces, pop2.s, pop2.trace_decay,
                         pop2.trace_scale, True)
    pop2.forward(jnp.zeros(pop_shape, jnp.float32))
    out2 = jax.block_until_ready(pop2.traces)
    assert jnp.allclose(out2, expected2, rtol=1e-6, atol=1e-6)

    # ------- fused multi-step (additive), T = 8 ------------------------------
    T = 8
    pop3 = NeuralPopulation(pop_shape, spike_trace=True,
                            additive_spike_trace=True, tau_s=12.0,
                            trace_scale=0.7)
    pop3.reset_state_variables()
    pop3.dt = 1.0
    pop3.compute_decay()
    pop3.traces = jax.random.uniform(k4, pop_shape, jnp.float32)
    spikes_T = jax.random.bernoulli(k1, 0.25, (T,) + pop_shape)

    expected3 = pop3.traces
    for t in range(T):
        expected3 = ref_step(expected3, spikes_T[t], pop3.trace_decay,
                             pop3.trace_scale, True)
    pop3.forward_steps(spikes_T)
    out3 = jax.block_until_ready(pop3.traces)
    assert jnp.allclose(out3, expected3, rtol=1e-5, atol=1e-5)

    # ------- fused multi-step (non-additive), T = 8 --------------------------
    pop4 = NeuralPopulation(pop_shape, spike_trace=True,
                            additive_spike_trace=False, tau_s=10.0)
    pop4.reset_state_variables()
    pop4.dt = 1.0
    pop4.compute_decay()
    pop4.traces = jax.random.uniform(k2, pop_shape, jnp.float32)
    spikes_T2 = jax.random.bernoulli(k3, 0.15, (T,) + pop_shape)

    expected4 = pop4.traces
    for t in range(T):
        expected4 = ref_step(expected4, spikes_T2[t], pop4.trace_decay,
                             pop4.trace_scale, False)
    pop4.forward_steps(spikes_T2)
    out4 = jax.block_until_ready(pop4.traces)
    assert jnp.allclose(out4, expected4, rtol=1e-5, atol=1e-5)

    print("KERNEL_OK")
</pallas_src>

<mosaic_0001>
module attributes {stable_mosaic.version = 11 : i64} {
  func.func @kernel(%arg0: i32, %arg1: memref<1xf32, #tpu.memory_space<smem>>, %arg2: memref<1xf32, #tpu.memory_space<smem>>, %arg3: memref<32x128xf32, #tpu.memory_space<vmem>>, %arg4: memref<32x128xi8, #tpu.memory_space<vmem>>, %arg5: memref<32x128xf32, #tpu.memory_space<vmem>>) attributes {dimension_semantics = [#tpu.dimension_semantics<parallel>], iteration_bounds = array<i64: 1>, scalar_prefetch = 0 : i64, scratch_operands = 0 : i64, tpu.core_type = #tpu.core_type<tc>, window_params = [{transform_indices = @transform_0, window_bounds = array<i64: 1>}, {transform_indices = @transform_1, window_bounds = array<i64: 1>}, {transform_indices = @transform_2, window_bounds = array<i64: 32, 128>}, {transform_indices = @transform_3, window_bounds = array<i64: 32, 128>}, {transform_indices = @transform_4, window_bounds = array<i64: 32, 128>}]} {
    %c0 = arith.constant 0 : index
    %0 = memref.load %arg1[%c0] : memref<1xf32, #tpu.memory_space<smem>>
    %c0_0 = arith.constant 0 : index
    %c0_1 = arith.constant 0 : index
    %1 = vector.load %arg3[%c0_0, %c0_1] : memref<32x128xf32, #tpu.memory_space<vmem>>, vector<32x128xf32>
    %2 = vector.broadcast %0 : f32 to vector<32x128xf32>
    %3 = arith.mulf %1, %2 : vector<32x128xf32>
    %c0_2 = arith.constant 0 : index
    %c0_3 = arith.constant 0 : index
    %4 = vector.load %arg4[%c0_2, %c0_3] : memref<32x128xi8, #tpu.memory_space<vmem>>, vector<32x128xi8>
    %c0_i8 = arith.constant 0 : i8
    %5 = vector.broadcast %c0_i8 : i8 to vector<32x128xi8>
    %6 = arith.cmpi ne, %4, %5 : vector<32x128xi8>
    %cst = arith.constant 1.000000e+00 : f32
    %7 = vector.broadcast %cst : f32 to vector<32x128xf32>
    %8 = arith.select %6, %7, %3 : vector<32x128xi1>, vector<32x128xf32>
    %c0_4 = arith.constant 0 : index
    %c0_5 = arith.constant 0 : index
    %9 = vector.load %arg5[%c0_4, %c0_5] : memref<32x128xf32, #tpu.memory_space<vmem>>, vector<32x128xf32>
    tpu.vector_store %arg5[%c0_4, %c0_5], %8 {strides = array<i32>} : memref<32x128xf32, #tpu.memory_space<vmem>>, vector<32x128xf32>,
    return
  }
  func.func @transform_0(%arg0: i32) -> i32 {
    %c0_i32 = arith.constant 0 : i32
    %c0_i32_0 = arith.constant 0 : i32
    return %c0_i32 : i32
  }
  func.func @transform_1(%arg0: i32) -> i32 {
    %c0_i32 = arith.constant 0 : i32
    %c0_i32_0 = arith.constant 0 : i32
    return %c0_i32 : i32
  }
  func.func @transform_2(%arg0: i32) -> (i32, i32) {
    %c0_i32 = arith.constant 0 : i32
    %c0_i32_0 = arith.constant 0 : i32
    return %arg0, %c0_i32 : i32, i32
  }
  func.func @transform_3(%arg0: i32) -> (i32, i32) {
    %c0_i32 = arith.constant 0 : i32
    %c0_i32_0 = arith.constant 0 : i32
    return %arg0, %c0_i32 : i32, i32
  }
  func.func @transform_4(%arg0: i32) -> (i32, i32) {
    %c0_i32 = arith.constant 0 : i32
    %c0_i32_0 = arith.constant 0 : i32
    return %arg0, %c0_i32 : i32, i32
  }
}

</mosaic_0001>

<bundles_post_ra>
// kernel: tpu_custom_call.1
= control target key start
LH: loop header
LB: loop body
LE: loop exit
PB: predicated region body
PF: predicated region fallthrough
CT: control target
= control target key end

     0   :  { %11 = vsyncpa [#allocation5], 0  ;;  %s199_s0 = inlined_call_operand.<no memory space> [shape: f32[1], index: 0, kind: input, shape index: {}]   ;;  %s200_s1 = inlined_call_operand.<no memory space> [shape: f32[1], index: 1, kind: input, shape index: {}]   ;;  %s201_s2 = inlined_call_operand.hbm [shape: f32[32,128], index: 2, kind: input, shape index: {}, may-alias: {2,4}]   ;;  %s202_s3 = inlined_call_operand.vmem [shape: s8[32,128], index: 3, kind: input, shape index: {}]   ;;  %s203_s4 = inlined_call_operand.hbm [shape: f32[32,128], index: 4, kind: output, shape index: {}, may-alias: {2,4}]  }
   0x1   :  { %12 = vsyncpa [#allocation6], 0  ;;  %s151_s15 = smov [#allocation4]  }
   0x2   :  { %s22_s16 = sshll.u32 %s151_s15, 4  ;;  %s23_s16 = int_to_ptr.vmem [resolvable:$true] %s22_s16 }
   0x3   :  { %s115_s17 = scalar_lea.vmem %s23_s16, 512  ;;  %p120_p1 = scmp.lt.s32.totalorder %s23_s16, %s23_s16 }
   0x4   :  { %p116_p0 = scmp.ne.s32.totalorder %s23_s16, %s115_s17  ;;  %p121_p2 = scmp.lt.s32.totalorder %s115_s17, %s115_s17 }
   0x6   :  { %p122_p3 = por %p121_p2, %p120_p1 }
   0x8   :  { %p123_p4 = pnand %p122_p3, %p116_p0 }
   0xa   :  { %126 = shalt.err (!%p123_p4)
}
   0xb   :  { %s152_s1 = smov 128   ;;  %s153_s18 = smov 8  }
   0xc   :  { %28 = dma.hbm_to_vmem [thread:$0]  %s201_s2, 512, %s23_s16, [#allocation5], %s152_s1, %s152_s1, %s153_s18  }
   0xd   :  { %147 = dma.done.wait [#allocation5], 512  }
   0xe   :  { %148 = vsyncadd [#allocation5], 4294966784  ;;  %v46_v0 = vld [vmem:[%s202_s3] sm:$0xff]  ;;  %v154_v1 = vmov 0   ;;  %v41_v7 = vstv %s199_s0  ;;  %v38_v10 = vld [vmem:[#allocation4 + $0x8] sm:$0xff]  ;;  %s155_s0 = smov [#allocation7]  }
   0xf   :  { %vm47_vm0 = vnez %v46_v0  ;;  %v37_v8 = vld [vmem:[#allocation4] sm:$0xff]  ;;  %v39_v12 = vld [vmem:[#allocation4 + $0x10] sm:$0xff]  ;;  %v40_v18 = vld [vmem:[#allocation4 + $0x18] sm:$0xff]  ;;  %v43_v21 = vmul.f32 %v41_v7, %v38_v10  ;;  %s90_s2 = sshll.u32 %s155_s0, 4  ;;  %s91_s2 = int_to_ptr.vmem [resolvable:$true] %s90_s2 }
  0x10   :  { %v48_v2 = vsel %vm47_vm0, 16843009, %v154_v1  ;;  %v42_v20 = vmul.f32 %v41_v7, %v37_v8  ;;  %v44_v22 = vmul.f32 %v41_v7, %v39_v12  ;;  %v45_v26 = vmul.f32 %v41_v7, %v40_v18  ;;  %s127_s3 = scalar_lea.vmem %s91_s2, 512  ;;  %p132_p6 = scmp.lt.s32.totalorder %s91_s2, %s91_s2 }
  0x11   :  { %v49_v3 = vunpack.c.0.s8 %v48_v2  ;;  %v50_v4 = vunpack.c.1.s8 %v48_v2  ;;  %v51_v5 = vunpack.c.2.s8 %v48_v2  ;;  %v52_v6 = vunpack.c.3.s8 %v48_v2  ;;  %p128_p5 = scmp.ne.s32.totalorder %s91_s2, %s127_s3  ;;  %p133_p7 = scmp.lt.s32.totalorder %s127_s3, %s127_s3 }
  0x13   :  { %v53_v9 = vpack.c.b16 %v49_v3, %v49_v3  ;;  %v55_v11 = vpack.c.b16 %v50_v4, %v50_v4  ;;  %v57_v13 = vpack.c.b16 %v51_v5, %v51_v5  ;;  %v59_v14 = vpack.c.b16 %v52_v6, %v52_v6  ;;  %p134_p8 = por %p133_p7, %p132_p6 }
  0x15   :  { %v54_v15 = vpack.c.b8 %v53_v9, %v53_v9  ;;  %v56_v16 = vpack.c.b8 %v55_v11, %v55_v11  ;;  %v58_v17 = vpack.c.b8 %v57_v13, %v57_v13  ;;  %v60_v19 = vpack.c.b8 %v59_v14, %v59_v14  ;;  %p135_p9 = pnand %p134_p8, %p128_p5 }
  0x17   :  { %vm61_vm1 = vnez %v54_v15  ;;  %vm62_vm2 = vnez %v56_v16  ;;  %vm63_vm3 = vnez %v58_v17  ;;  %vm64_vm4 = vnez %v60_v19 }
  0x18   :  { %v65_v23 = vsel %vm61_vm1, 16843009, %v154_v1  ;;  %v66_v24 = vsel %vm62_vm2, 16843009, %v154_v1  ;;  %v67_v25 = vsel %vm63_vm3, 16843009, %v154_v1 }
  0x19   :  { %v69_v27 = vunpack.c.0.s8 %v65_v23  ;;  %v70_v28 = vunpack.c.0.s8 %v66_v24  ;;  %v71_v29 = vunpack.c.0.s8 %v67_v25  ;;  %v68_v30 = vsel %vm64_vm4, 16843009, %v154_v1 }
  0x1a   :  { %v72_v31 = vunpack.c.0.s8 %v68_v30 }
  0x1b   :  { %vm73_vm5 = vcmp.ne.s32.totalorder %v69_v27, 0  ;;  %vm74_vm6 = vcmp.ne.s32.totalorder %v70_v28, 0  ;;  %vm75_vm7 = vcmp.ne.s32.totalorder %v71_v29, 0 }
  0x1c   :  { %v77_v32 = vsel %vm73_vm5, 1.0, %v42_v20  ;;  %v78_v33 = vsel %vm74_vm6, 1.0, %v43_v21  ;;  %v79_v34 = vsel %vm75_vm7, 1.0, %v44_v22  ;;  %vm76_vm8 = vcmp.ne.s32.totalorder %v72_v31, 0 }
  0x1d   :  { %81 = vst [vmem:[#allocation7] sm:$0xff] %v77_v32  ;;  %82 = vst [vmem:[#allocation7 + $0x8] sm:$0xff] %v78_v33  ;;  %v80_v35 = vsel %vm76_vm8, 1.0, %v45_v26 }
  0x1e   :  { %83 = vst [vmem:[#allocation7 + $0x10] sm:$0xff] %v79_v34  ;;  %84 = vst [vmem:[#allocation7 + $0x18] sm:$0xff] %v80_v35 }
  0x1f   :  { %138 = shalt.err (!%p135_p9)
}
  0x20   :  { %96 = dma.vmem_to_hbm [thread:$0]  %s91_s2, 512, %s203_s4, [#allocation6], %s152_s1, %s152_s1, %s153_s18  }
  0x21   :  { %149 = dma.done.wait [#allocation6], 512  }
  0x22   :  { %150 = vsyncadd [#allocation6], 4294966784 }
  0x23   :  { %100 = vsyncpa [#allocation5], 1 }
  0x24   :  { %101 = vsyncpa [#allocation6], 1 }

</bundles_post_ra>
